<compile_context>
chip_gen: v7x
topology: tpu7x:2x2x1
jax: 0.10.0
libtpu: 0.0.40
codegen_flags: <defaults>
</compile_context>

<pallas_src>
import functools

import jax
import jax.numpy as jnp
from jax.experimental import pallas as pl
from jax.experimental.pallas import tpu as pltpu


# ------------------------------ small helpers ------------------------------

def _round_up(x, m):
    return (x + m - 1) // m * m


def _sigmoid(x):
    # softmax over 2 gates == sigmoid(att_l - att_r); exp goes to the EUP,
    # the divide is exact (keeps us inside the 1e-4 tolerance).
    return 1.0 / (1.0 + jnp.exp(-x))


def _vmem_capacity_bytes():
    try:
        return int(pltpu.get_tpu_info().vmem_capacity_bytes)
    except Exception:
        return 64 * 1024 * 1024          # be conservative (v7x-sized VMEM)


# ------------------------------ Pallas kernels -----------------------------

def _dem_fused_kernel(rgb_ref, hha_ref,
                      w1rg_ref, w1rm_ref, b1r_ref, w2r_ref, b2r_ref,
                      w1hg_ref, w1hm_ref, b1h_ref, w2h_ref, b2h_ref,
                      dga_ref, dgb_ref, db_ref,
                      rgb_out_ref, hha_out_ref, *, inv_hw):
    """Single-pass DEM for one batch element: pool + SE MLPs + gate + fuse."""
    rgb = rgb_ref[0].astype(jnp.float32)                      # (C, HW)
    hha = hha_ref[0].astype(jnp.float32)                      # (C, HW)

    # global average pool (per channel)
    p_rgb = jnp.sum(rgb, axis=1, keepdims=True) * inv_hw      # (C, 1)
    p_hha = jnp.sum(hha, axis=1, keepdims=True) * inv_hw      # (C, 1)

    # SE MLP of fsp_rgb: combined = cat(pooled_hha, pooled_rgb)
    h_r = jnp.sum(w1rg_ref[...] * p_hha + w1rm_ref[...] * p_rgb,
                  axis=0, keepdims=True) + b1r_ref[...]        # (1, hid)
    h_r = jnp.maximum(h_r, 0.0)
    cw_r = _sigmoid(jnp.sum(w2r_ref[...] * h_r, axis=1, keepdims=True)
                    + b2r_ref[...])                            # (C, 1)

    # SE MLP of fsp_hha: combined = cat(pooled_rgb, pooled_hha)
    h_h = jnp.sum(w1hg_ref[...] * p_rgb + w1hm_ref[...] * p_hha,
                  axis=0, keepdims=True) + b1h_ref[...]        # (1, hid)
    h_h = jnp.maximum(h_h, 0.0)
    cw_h = _sigmoid(jnp.sum(w2h_ref[...] * h_h, axis=1, keepdims=True)
                    + b2h_ref[...])                            # (C, 1)

    # fold both gate convs onto the raw streams (att_l - att_r weights)
    dw_rgb = dga_ref[...] + dgb_ref[...] * cw_h                # (C, 1)
    dw_hha = dga_ref[...] * cw_r + dgb_ref[...]                # (C, 1)

    diff = (jnp.sum(dw_rgb * rgb + dw_hha * hha, axis=0, keepdims=True)
            + db_ref[0])                                       # (1, HW)
    al = _sigmoid(diff)                                        # gate on rgb
    merge = hha + al * (rgb - hha)                             # rgb*al + hha*(1-al)
    rgb_out_ref[0] = jnp.maximum((rgb + merge) * 0.5, 0.0).astype(rgb_out_ref.dtype)
    hha_out_ref[0] = jnp.maximum((hha + merge) * 0.5, 0.0).astype(hha_out_ref.dtype)


def _pool_kernel(rgb_ref, hha_ref, rmean_ref, hmean_ref, racc, hacc,
                 *, n_tiles, rem, inv_hw):
    """Per-channel spatial means, accumulated in a lane-dense VMEM scratch.

    grid = (n_split, B, n_tiles_per_split); axis 2 is the reduction axis.
    `rem` is the number of valid lanes of the (single) ragged last tile, or
    None when the tile size divides HW exactly.
    """
    t = pl.program_id(2)

    @pl.when(t == 0)
    def _():
        racc[...] = jnp.zeros_like(racc)
        hacc[...] = jnp.zeros_like(hacc)

    rgb = rgb_ref[0].astype(jnp.float32)                       # (C, T)
    hha = hha_ref[0].astype(jnp.float32)                       # (C, T)

    if rem is None:
        racc[...] += rgb
        hacc[...] += hha
    else:
        tile_id = pl.program_id(0) * pl.num_programs(2) + t

        @pl.when(tile_id < n_tiles - 1)
        def _():
            racc[...] += rgb
            hacc[...] += hha

        @pl.when(tile_id == n_tiles - 1)
        def _():
            # OOB part of a ragged block is undefined on load -> select it away.
            mask = jax.lax.broadcasted_iota(jnp.int32, racc.shape, 1) < rem
            racc[...] += jnp.where(mask, rgb, 0.0)
            hacc[...] += jnp.where(mask, hha, 0.0)

    @pl.when(t == pl.num_programs(2) - 1)
    def _():
        rmean_ref[0, 0] = jnp.sum(racc[...], axis=1, keepdims=True) * inv_hw
        hmean_ref[0, 0] = jnp.sum(hacc[...], axis=1, keepdims=True) * inv_hw


def _fuse_kernel(rgb_ref, hha_ref, dw_rgb_ref, dw_hha_ref, db_ref,
                 rgb_out_ref, hha_out_ref):
    """Folded gate + sigmoid + merge + residual + ReLU on one (C, T) tile."""
    rgb = rgb_ref[0].astype(jnp.float32)                       # (C, T)
    hha = hha_ref[0].astype(jnp.float32)                       # (C, T)
    diff = (jnp.sum(dw_rgb_ref[0] * rgb + dw_hha_ref[0] * hha,
                    axis=0, keepdims=True) + db_ref[0])        # (1, T)
    al = _sigmoid(diff)
    merge = hha + al * (rgb - hha)
    rgb_out_ref[0] = jnp.maximum((rgb + merge) * 0.5, 0.0).astype(rgb_out_ref.dtype)
    hha_out_ref[0] = jnp.maximum((hha + merge) * 0.5, 0.0).astype(hha_out_ref.dtype)


# --------------------------------- wrapper ---------------------------------

def dem_pallas(rgb, hha, params, *, force_tiled=False, pool_split=None,
               max_tile_bytes=None):
    """DEM forward.  rgb, hha: (B, C, H, W).  Returns (rgb_out, hha_out)."""
    assert rgb.shape == hha.shape and rgb.ndim == 4
    B, C, H, W = rgb.shape
    HW = H * W
    out_dtype = rgb.dtype
    elem = jnp.dtype(out_dtype).itemsize
    f32 = jnp.float32

    # generation-aware budgets
    vmem_cap = _vmem_capacity_bytes()
    if vmem_cap >= 100 * 1024 * 1024:            # v5e / v6e: 128 MiB VMEM
        gen_tile_bytes = 4 * 1024 * 1024
        gen_vmem_limit = 64 * 1024 * 1024
        fast_budget = 48 * 1024 * 1024
        two_core = False
    else:                                        # v7x (or unknown): 64 MiB VMEM
        gen_tile_bytes = 2 * 1024 * 1024
        gen_vmem_limit = 32 * 1024 * 1024
        fast_budget = 24 * 1024 * 1024
        two_core = True
    if max_tile_bytes is None:
        max_tile_bytes = gen_tile_bytes

    rgb3 = rgb.reshape(B, C, HW)                 # layout-preserving, no copy
    hha3 = hha.reshape(B, C, HW)

    # gate-conv folding constants (model constants, O(C))
    dg = (params["gw_r"] - params["gw_h"]).astype(f32)          # (2C,)
    dg_a, dg_b = dg[:C], dg[C:]
    db = (params["gb_r"] - params["gb_h"]).reshape(1).astype(f32)
    smem_spec = pl.BlockSpec(memory_space=pltpu.MemorySpace.SMEM)

    # ---------------- fast path: single fused pass per batch ----------------
    fused_bytes = 8 * C * HW * elem              # 2 in + 2 out, double-buffered
    if (not force_tiled) and fused_bytes <= fast_budget:
        hid = params["b1_r"].shape[0]
        w1rg = params["w1_r"][:, :C].T.astype(f32)      # (C, hid) guide = hha
        w1rm = params["w1_r"][:, C:].T.astype(f32)      # (C, hid) main  = rgb
        b1r = params["b1_r"].reshape(1, hid).astype(f32)
        w2r = params["w2_r"].astype(f32)                # (C, hid)
        b2r = params["b2_r"].reshape(C, 1).astype(f32)
        w1hg = params["w1_h"][:, :C].T.astype(f32)      # guide = rgb
        w1hm = params["w1_h"][:, C:].T.astype(f32)      # main  = hha
        b1h = params["b1_h"].reshape(1, hid).astype(f32)
        w2h = params["w2_h"].astype(f32)
        b2h = params["b2_h"].reshape(C, 1).astype(f32)
        dga = dg_a.reshape(C, 1)
        dgb = dg_b.reshape(C, 1)

        io_spec = pl.BlockSpec((1, C, HW), lambda b: (b, 0, 0))

        def const_spec(shape):
            return pl.BlockSpec(shape, lambda b: (0, 0))

        vmem_limit = min(gen_vmem_limit,
                         max(fused_bytes + 4 * 1024 * 1024, 8 * 1024 * 1024))
        kernel = functools.partial(_dem_fused_kernel, inv_hw=1.0 / HW)
        rgb_out, hha_out = pl.pallas_call(
            kernel,
            out_shape=(jax.ShapeDtypeStruct((B, C, HW), out_dtype),
                       jax.ShapeDtypeStruct((B, C, HW), out_dtype)),
            grid=(B,),
            in_specs=[io_spec, io_spec,
                      const_spec((C, hid)), const_spec((C, hid)),
                      const_spec((1, hid)), const_spec((C, hid)),
                      const_spec((C, 1)),
                      const_spec((C, hid)), const_spec((C, hid)),
                      const_spec((1, hid)), const_spec((C, hid)),
                      const_spec((C, 1)),
                      const_spec((C, 1)), const_spec((C, 1)),
                      smem_spec],
            out_specs=(io_spec, io_spec),
            compiler_params=pltpu.CompilerParams(
                dimension_semantics=("parallel",),
                vmem_limit_bytes=vmem_limit),
        )(rgb3, hha3,
          w1rg, w1rm, b1r, w2r, b2r,
          w1hg, w1hm, b1h, w2h, b2h,
          dga, dgb, db)
        return (rgb_out.reshape(B, C, H, W), hha_out.reshape(B, C, H, W))

    # ---------------- tiled two-pass path (large feature maps) --------------
    # spatial tile: multiple of 128 lanes (unmasked stores), capped by VMEM budget
    t_cap = max(128, (max_tile_bytes // (C * 4)) // 128 * 128)
    T = min(_round_up(HW, 128), t_cap)
    n_t = pl.cdiv(HW, T)
    rem = (HW - (n_t - 1) * T) if (HW % T) != 0 else None

    # optional pool split (per-core partial sums) so both v7x TCs stream HBM
    if pool_split is None:
        pool_split = 2 if (two_core and B == 1) else 1
    n_split = max(1, min(int(pool_split), n_t))
    while n_t % n_split != 0:                   # only exact splits (no clamping)
        n_split -= 1
    n_ts = n_t // n_split

    tile_bytes = C * T * 4
    vmem_limit = min(gen_vmem_limit,
                     max(8 * tile_bytes + 4 * 1024 * 1024, 16 * 1024 * 1024))

    # ---- pass 1: global average pooling (accumulator reduction) ----
    pool_in_spec = pl.BlockSpec((1, C, T), lambda s, b, t: (b, 0, s * n_ts + t))
    pool_out_spec = pl.BlockSpec((1, 1, C, 1), lambda s, b, t: (s, b, 0, 0))
    pool_kernel = functools.partial(_pool_kernel, n_tiles=n_t, rem=rem,
                                    inv_hw=1.0 / HW)
    rmean, hmean = pl.pallas_call(
        pool_kernel,
        out_shape=(jax.ShapeDtypeStruct((n_split, B, C, 1), f32),
                   jax.ShapeDtypeStruct((n_split, B, C, 1), f32)),
        grid=(n_split, B, n_ts),
        in_specs=[pool_in_spec, pool_in_spec],
        out_specs=(pool_out_spec, pool_out_spec),
        scratch_shapes=[pltpu.VMEM((C, T), f32), pltpu.VMEM((C, T), f32)],
        compiler_params=pltpu.CompilerParams(
            dimension_semantics=("parallel", "parallel", "arbitrary"),
            vmem_limit_bytes=vmem_limit),
    )(rgb3, hha3)
    pooled_rgb = jnp.sum(rmean, axis=0)[:, :, 0]            # (B, C)
    pooled_hha = jnp.sum(hmean, axis=0)[:, :, 0]            # (B, C)

    # ---- tiny SE MLPs + gate-weight folding in plain XLA (O(B*C*hid)) ----
    def se_mlp(comb, w1, b1, w2, b2):
        h = jax.nn.relu(comb @ w1.T.astype(f32) + b1.astype(f32))
        return jax.nn.sigmoid(h @ w2.T.astype(f32) + b2.astype(f32))

    cw_r = se_mlp(jnp.concatenate([pooled_hha, pooled_rgb], axis=1),
                  params["w1_r"], params["b1_r"], params["w2_r"], params["b2_r"])
    cw_h = se_mlp(jnp.concatenate([pooled_rgb, pooled_hha], axis=1),
                  params["w1_h"], params["b1_h"], params["w2_h"], params["b2_h"])

    dw_rgb = (dg_a[None, :] + dg_b[None, :] * cw_h).reshape(B, C, 1).astype(f32)
    dw_hha = (dg_a[None, :] * cw_r + dg_b[None, :]).reshape(B, C, 1).astype(f32)

    # ---- pass 2: folded gate + sigmoid + merge + residual + ReLU ----
    fuse_tile_spec = pl.BlockSpec((1, C, T), lambda b, t: (b, 0, t))
    chan_spec = pl.BlockSpec((1, C, 1), lambda b, t: (b, 0, 0))
    rgb_out, hha_out = pl.pallas_call(
        _fuse_kernel,
        out_shape=(jax.ShapeDtypeStruct((B, C, HW), out_dtype),
                   jax.ShapeDtypeStruct((B, C, HW), out_dtype)),
        grid=(B, n_t),
        in_specs=[fuse_tile_spec, fuse_tile_spec, chan_spec, chan_spec, smem_spec],
        out_specs=(fuse_tile_spec, fuse_tile_spec),
        compiler_params=pltpu.CompilerParams(
            dimension_semantics=("parallel", "parallel"),
            vmem_limit_bytes=vmem_limit),
    )(rgb3, hha3, dw_rgb, dw_hha, db)

    return (rgb_out.reshape(B, C, H, W), hha_out.reshape(B, C, H, W))


# --------------------------- reference & params ----------------------------

def dem_reference(rgb, hha, params):
    """Pure-JAX reference mirroring the PyTorch DEM forward."""
    rgb = rgb.astype(jnp.float32)
    hha = hha.astype(jnp.float32)
    pr = rgb.mean(axis=(2, 3))
    ph = hha.mean(axis=(2, 3))

    def se_mlp(comb, w1, b1, w2, b2):
        h = jax.nn.relu(comb @ w1.T + b1)
        return jax.nn.sigmoid(h @ w2.T + b2)

    cw_r = se_mlp(jnp.concatenate([ph, pr], axis=1),
                  params["w1_r"], params["b1_r"], params["w2_r"], params["b2_r"])
    cw_h = se_mlp(jnp.concatenate([pr, ph], axis=1),
                  params["w1_h"], params["b1_h"], params["w2_h"], params["b2_h"])

    rec_rgb = rgb + cw_r[:, :, None, None] * hha
    rec_hha = hha + cw_h[:, :, None, None] * rgb
    cat_fea = jnp.concatenate([rec_rgb, rec_hha], axis=1)

    att_l = jnp.einsum("bchw,c->bhw", cat_fea, params["gw_r"]) + params["gb_r"]
    att_r = jnp.einsum("bchw,c->bhw", cat_fea, params["gw_h"]) + params["gb_h"]
    att = jax.nn.softmax(jnp.stack([att_l, att_r], axis=1), axis=1)
    al, ar = att[:, 0:1], att[:, 1:2]

    merge = rgb * al + hha * ar
    return (jax.nn.relu((rgb + merge) / 2.0), jax.nn.relu((hha + merge) / 2.0))


def init_params(key, in_planes, out_planes, reduction):
    hid = out_planes // reduction
    ks = jax.random.split(key, 12)
    s = 0.1
    return {
        "w1_r": s * jax.random.normal(ks[0], (hid, 2 * in_planes), jnp.float32),
        "b1_r": s * jax.random.normal(ks[1], (hid,), jnp.float32),
        "w2_r": s * jax.random.normal(ks[2], (out_planes, hid), jnp.float32),
        "b2_r": s * jax.random.normal(ks[3], (out_planes,), jnp.float32),
        "w1_h": s * jax.random.normal(ks[4], (hid, 2 * in_planes), jnp.float32),
        "b1_h": s * jax.random.normal(ks[5], (hid,), jnp.float32),
        "w2_h": s * jax.random.normal(ks[6], (out_planes, hid), jnp.float32),
        "b2_h": s * jax.random.normal(ks[7], (out_planes,), jnp.float32),
        "gw_r": s * jax.random.normal(ks[8], (2 * in_planes,), jnp.float32),
        "gb_r": s * jax.random.normal(ks[9], (1,), jnp.float32),
        "gw_h": s * jax.random.normal(ks[10], (2 * in_planes,), jnp.float32),
        "gb_h": s * jax.random.normal(ks[11], (1,), jnp.float32),
    }


if __name__ == "__main__":
    key = jax.random.PRNGKey(0)
    k1, k2, k3, k4, k5, k6 = jax.random.split(key, 6)

    # --- test 1: small feature map -> fused single-pass kernel ---
    B, C, H, W = 2, 32, 16, 16                 # in_planes=out_planes=32, hid=2
    rgb = jax.random.normal(k1, (B, C, H, W), jnp.float32)
    hha = jax.random.normal(k2, (B, C, H, W), jnp.float32)
    params = init_params(k3, in_planes=C, out_planes=C, reduction=16)

    out = jax.block_until_ready(dem_pallas(rgb, hha, params))
    ref = dem_reference(rgb, hha, params)
    assert jnp.allclose(out[0], ref[0], atol=1e-4, rtol=1e-4)
    assert jnp.allclose(out[1], ref[1], atol=1e-4, rtol=1e-4)

    # --- test 2: tiled two-pass path with ragged tiles + split pool reduce ---
    B2, C2, H2, W2 = 1, 32, 45, 45             # HW = 2025 (not a multiple of 128)
    rgb2 = jax.random.normal(k4, (B2, C2, H2, W2), jnp.float32)
    hha2 = jax.random.normal(k5, (B2, C2, H2, W2), jnp.float32)
    params2 = init_params(k6, in_planes=C2, out_planes=C2, reduction=16)

    out2 = jax.block_until_ready(
        dem_pallas(rgb2, hha2, params2, force_tiled=True, pool_split=2,
                   max_tile_bytes=C2 * 128 * 4))   # forces T=128 -> 16 tiles
    ref2 = dem_reference(rgb2, hha2, params2)
    assert jnp.allclose(out2[0], ref2[0], atol=1e-4, rtol=1e-4)
    assert jnp.allclose(out2[1], ref2[1], atol=1e-4, rtol=1e-4)

    print("KERNEL_OK")
</pallas_src>

<mosaic_0001>
module attributes {stable_mosaic.version = 11 : i64} {
  func.func @_dem_fused_kernel(%arg0: i32, %arg1: memref<1x32x256xf32, #tpu.memory_space<vmem>>, %arg2: memref<1x32x256xf32, #tpu.memory_space<vmem>>, %arg3: memref<32x2xf32, #tpu.memory_space<vmem>>, %arg4: memref<32x2xf32, #tpu.memory_space<vmem>>, %arg5: memref<1x2xf32, #tpu.memory_space<vmem>>, %arg6: memref<32x2xf32, #tpu.memory_space<vmem>>, %arg7: memref<32x1xf32, #tpu.memory_space<vmem>>, %arg8: memref<32x2xf32, #tpu.memory_space<vmem>>, %arg9: memref<32x2xf32, #tpu.memory_space<vmem>>, %arg10: memref<1x2xf32, #tpu.memory_space<vmem>>, %arg11: memref<32x2xf32, #tpu.memory_space<vmem>>, %arg12: memref<32x1xf32, #tpu.memory_space<vmem>>, %arg13: memref<32x1xf32, #tpu.memory_space<vmem>>, %arg14: memref<32x1xf32, #tpu.memory_space<vmem>>, %arg15: memref<1xf32, #tpu.memory_space<smem>>, %arg16: memref<1x32x256xf32, #tpu.memory_space<vmem>>, %arg17: memref<1x32x256xf32, #tpu.memory_space<vmem>>) attributes {dimension_semantics = [#tpu.dimension_semantics<parallel>], iteration_bounds = array<i64: 2>, scalar_prefetch = 0 : i64, scratch_operands = 0 : i64, tpu.core_type = #tpu.core_type<tc>, window_params = [{transform_indices = @transform_0, window_bounds = array<i64: 1, 32, 256>}, {transform_indices = @transform_1, window_bounds = array<i64: 1, 32, 256>}, {pipeline_mode = #tpu.pipeline_mode<synchronous>, transform_indices = @transform_2, window_bounds = array<i64: 32, 2>}, {pipeline_mode = #tpu.pipeline_mode<synchronous>, transform_indices = @transform_3, window_bounds = array<i64: 32, 2>}, {pipeline_mode = #tpu.pipeline_mode<synchronous>, transform_indices = @transform_4, window_bounds = array<i64: 1, 2>}, {pipeline_mode = #tpu.pipeline_mode<synchronous>, transform_indices = @transform_5, window_bounds = array<i64: 32, 2>}, {pipeline_mode = #tpu.pipeline_mode<synchronous>, transform_indices = @transform_6, window_bounds = array<i64: 32, 1>}, {pipeline_mode = #tpu.pipeline_mode<synchronous>, transform_indices = @transform_7, window_bounds = array<i64: 32, 2>}, {pipeline_mode = #tpu.pipeline_mode<synchronous>, transform_indices = @transform_8, window_bounds = array<i64: 32, 2>}, {pipeline_mode = #tpu.pipeline_mode<synchronous>, transform_indices = @transform_9, window_bounds = array<i64: 1, 2>}, {pipeline_mode = #tpu.pipeline_mode<synchronous>, transform_indices = @transform_10, window_bounds = array<i64: 32, 2>}, {pipeline_mode = #tpu.pipeline_mode<synchronous>, transform_indices = @transform_11, window_bounds = array<i64: 32, 1>}, {pipeline_mode = #tpu.pipeline_mode<synchronous>, transform_indices = @transform_12, window_bounds = array<i64: 32, 1>}, {pipeline_mode = #tpu.pipeline_mode<synchronous>, transform_indices = @transform_13, window_bounds = array<i64: 32, 1>}, {transform_indices = @transform_14, window_bounds = array<i64: 1>}, {transform_indices = @transform_15, window_bounds = array<i64: 1, 32, 256>}, {transform_indices = @transform_16, window_bounds = array<i64: 1, 32, 256>}]} {
    %c0 = arith.constant 0 : index
    %c0_0 = arith.constant 0 : index
    %c0_1 = arith.constant 0 : index
    %0 = vector.load %arg1[%c0, %c0_0, %c0_1] : memref<1x32x256xf32, #tpu.memory_space<vmem>>, vector<1x32x256xf32>
    %1 = vector.shape_cast %0 : vector<1x32x256xf32> to vector<32x256xf32>
    %c0_2 = arith.constant 0 : index
    %c0_3 = arith.constant 0 : index
    %c0_4 = arith.constant 0 : index
    %2 = vector.load %arg2[%c0_2, %c0_3, %c0_4] : memref<1x32x256xf32, #tpu.memory_space<vmem>>, vector<1x32x256xf32>
    %3 = vector.shape_cast %2 : vector<1x32x256xf32> to vector<32x256xf32>
    %cst = arith.constant dense<0.000000e+00> : vector<32xf32>
    %4 = vector.multi_reduction <add>, %1, %cst [1] : vector<32x256xf32> to vector<32xf32>
    %5 = vector.shape_cast %4 : vector<32xf32> to vector<32x1xf32>
    %cst_5 = arith.constant 3.906250e-03 : f32
    %6 = vector.broadcast %cst_5 : f32 to vector<32x1xf32>
    %7 = arith.mulf %5, %6 : vector<32x1xf32>
    %cst_6 = arith.constant dense<0.000000e+00> : vector<32xf32>
    %8 = vector.multi_reduction <add>, %3, %cst_6 [1] : vector<32x256xf32> to vector<32xf32>
    %9 = vector.shape_cast %8 : vector<32xf32> to vector<32x1xf32>
    %cst_7 = arith.constant 3.906250e-03 : f32
    %10 = vector.broadcast %cst_7 : f32 to vector<32x1xf32>
    %11 = arith.mulf %9, %10 : vector<32x1xf32>
    %c0_8 = arith.constant 0 : index
    %c0_9 = arith.constant 0 : index
    %12 = vector.load %arg3[%c0_8, %c0_9] : memref<32x2xf32, #tpu.memory_space<vmem>>, vector<32x2xf32>
    %13 = vector.broadcast %11 : vector<32x1xf32> to vector<32x2xf32>
    %14 = arith.mulf %12, %13 : vector<32x2xf32>
    %c0_10 = arith.constant 0 : index
    %c0_11 = arith.constant 0 : index
    %15 = vector.load %arg4[%c0_10, %c0_11] : memref<32x2xf32, #tpu.memory_space<vmem>>, vector<32x2xf32>
    %16 = vector.broadcast %7 : vector<32x1xf32> to vector<32x2xf32>
    %17 = arith.mulf %15, %16 : vector<32x2xf32>
    %18 = arith.addf %14, %17 : vector<32x2xf32>
    %cst_12 = arith.constant dense<0.000000e+00> : vector<2xf32>
    %19 = vector.multi_reduction <add>, %18, %cst_12 [0] : vector<32x2xf32> to vector<2xf32>
    %20 = vector.shape_cast %19 : vector<2xf32> to vector<1x2xf32>
    %c0_13 = arith.constant 0 : index
    %c0_14 = arith.constant 0 : index
    %21 = vector.load %arg5[%c0_13, %c0_14] : memref<1x2xf32, #tpu.memory_space<vmem>>, vector<1x2xf32>
    %22 = arith.addf %20, %21 : vector<1x2xf32>
    %cst_15 = arith.constant 0.000000e+00 : f32
    %23 = vector.broadcast %cst_15 : f32 to vector<1x2xf32>
    %24 = arith.maximumf %22, %23 : vector<1x2xf32>
    %c0_16 = arith.constant 0 : index
    %c0_17 = arith.constant 0 : index
    %25 = vector.load %arg6[%c0_16, %c0_17] : memref<32x2xf32, #tpu.memory_space<vmem>>, vector<32x2xf32>
    %26 = vector.broadcast %24 : vector<1x2xf32> to vector<32x2xf32>
    %27 = arith.mulf %25, %26 : vector<32x2xf32>
    %cst_18 = arith.constant dense<0.000000e+00> : vector<32xf32>
    %28 = vector.multi_reduction <add>, %27, %cst_18 [1] : vector<32x2xf32> to vector<32xf32>
    %29 = vector.shape_cast %28 : vector<32xf32> to vector<32x1xf32>
    %c0_19 = arith.constant 0 : index
    %c0_20 = arith.constant 0 : index
    %30 = vector.load %arg7[%c0_19, %c0_20] : memref<32x1xf32, #tpu.memory_space<vmem>>, vector<32x1xf32>
    %31 = arith.addf %29, %30 : vector<32x1xf32>
    %cst_21 = arith.constant 0.000000e+00 : f32
    %32 = vector.broadcast %cst_21 : f32 to vector<32x1xf32>
    %33 = arith.subf %32, %31 : vector<32x1xf32>
    %34 = math.exp %33 : vector<32x1xf32>
    %cst_22 = arith.constant 1.000000e+00 : f32
    %35 = vector.broadcast %cst_22 : f32 to vector<32x1xf32>
    %36 = arith.addf %35, %34 : vector<32x1xf32>
    %cst_23 = arith.constant 1.000000e+00 : f32
    %37 = vector.broadcast %cst_23 : f32 to vector<32x1xf32>
    %38 = arith.divf %37, %36 : vector<32x1xf32>
    %c0_24 = arith.constant 0 : index
    %c0_25 = arith.constant 0 : index
    %39 = vector.load %arg8[%c0_24, %c0_25] : memref<32x2xf32, #tpu.memory_space<vmem>>, vector<32x2xf32>
    %40 = vector.broadcast %7 : vector<32x1xf32> to vector<32x2xf32>
    %41 = arith.mulf %39, %40 : vector<32x2xf32>
    %c0_26 = arith.constant 0 : index
    %c0_27 = arith.constant 0 : index
    %42 = vector.load %arg9[%c0_26, %c0_27] : memref<32x2xf32, #tpu.memory_space<vmem>>, vector<32x2xf32>
    %43 = vector.broadcast %11 : vector<32x1xf32> to vector<32x2xf32>
    %44 = arith.mulf %42, %43 : vector<32x2xf32>
    %45 = arith.addf %41, %44 : vector<32x2xf32>
    %cst_28 = arith.constant dense<0.000000e+00> : vector<2xf32>
    %46 = vector.multi_reduction <add>, %45, %cst_28 [0] : vector<32x2xf32> to vector<2xf32>
    %47 = vector.shape_cast %46 : vector<2xf32> to vector<1x2xf32>
    %c0_29 = arith.constant 0 : index
    %c0_30 = arith.constant 0 : index
    %48 = vector.load %arg10[%c0_29, %c0_30] : memref<1x2xf32, #tpu.memory_space<vmem>>, vector<1x2xf32>
    %49 = arith.addf %47, %48 : vector<1x2xf32>
    %cst_31 = arith.constant 0.000000e+00 : f32
    %50 = vector.broadcast %cst_31 : f32 to vector<1x2xf32>
    %51 = arith.maximumf %49, %50 : vector<1x2xf32>
    %c0_32 = arith.constant 0 : index
    %c0_33 = arith.constant 0 : index
    %52 = vector.load %arg11[%c0_32, %c0_33] : memref<32x2xf32, #tpu.memory_space<vmem>>, vector<32x2xf32>
    %53 = vector.broadcast %51 : vector<1x2xf32> to vector<32x2xf32>
    %54 = arith.mulf %52, %53 : vector<32x2xf32>
    %cst_34 = arith.constant dense<0.000000e+00> : vector<32xf32>
    %55 = vector.multi_reduction <add>, %54, %cst_34 [1] : vector<32x2xf32> to vector<32xf32>
    %56 = vector.shape_cast %55 : vector<32xf32> to vector<32x1xf32>
    %c0_35 = arith.constant 0 : index
    %c0_36 = arith.constant 0 : index
    %57 = vector.load %arg12[%c0_35, %c0_36] : memref<32x1xf32, #tpu.memory_space<vmem>>, vector<32x1xf32>
    %58 = arith.addf %56, %57 : vector<32x1xf32>
    %cst_37 = arith.constant 0.000000e+00 : f32
    %59 = vector.broadcast %cst_37 : f32 to vector<32x1xf32>
    %60 = arith.subf %59, %58 : vector<32x1xf32>
    %61 = math.exp %60 : vector<32x1xf32>
    %cst_38 = arith.constant 1.000000e+00 : f32
    %62 = vector.broadcast %cst_38 : f32 to vector<32x1xf32>
    %63 = arith.addf %62, %61 : vector<32x1xf32>
    %cst_39 = arith.constant 1.000000e+00 : f32
    %64 = vector.broadcast %cst_39 : f32 to vector<32x1xf32>
    %65 = arith.divf %64, %63 : vector<32x1xf32>
    %c0_40 = arith.constant 0 : index
    %c0_41 = arith.constant 0 : index
    %66 = vector.load %arg13[%c0_40, %c0_41] : memref<32x1xf32, #tpu.memory_space<vmem>>, vector<32x1xf32>
    %c0_42 = arith.constant 0 : index
    %c0_43 = arith.constant 0 : index
    %67 = vector.load %arg14[%c0_42, %c0_43] : memref<32x1xf32, #tpu.memory_space<vmem>>, vector<32x1xf32>
    %68 = arith.mulf %67, %65 : vector<32x1xf32>
    %69 = arith.addf %66, %68 : vector<32x1xf32>
    %c0_44 = arith.constant 0 : index
    %c0_45 = arith.constant 0 : index
    %70 = vector.load %arg13[%c0_44, %c0_45] : memref<32x1xf32, #tpu.memory_space<vmem>>, vector<32x1xf32>
    %71 = arith.mulf %70, %38 : vector<32x1xf32>
    %c0_46 = arith.constant 0 : index
    %c0_47 = arith.constant 0 : index
    %72 = vector.load %arg14[%c0_46, %c0_47] : memref<32x1xf32, #tpu.memory_space<vmem>>, vector<32x1xf32>
    %73 = arith.addf %71, %72 : vector<32x1xf32>
    %74 = vector.broadcast %69 : vector<32x1xf32> to vector<32x256xf32>
    %75 = arith.mulf %74, %1 : vector<32x256xf32>
    %76 = vector.broadcast %73 : vector<32x1xf32> to vector<32x256xf32>
    %77 = arith.mulf %76, %3 : vector<32x256xf32>
    %78 = arith.addf %75, %77 : vector<32x256xf32>
    %cst_48 = arith.constant dense<0.000000e+00> : vector<256xf32>
    %79 = vector.multi_reduction <add>, %78, %cst_48 [0] : vector<32x256xf32> to vector<256xf32>
    %80 = vector.shape_cast %79 : vector<256xf32> to vector<1x256xf32>
    %c0_49 = arith.constant 0 : index
    %81 = memref.load %arg15[%c0_49] : memref<1xf32, #tpu.memory_space<smem>>
    %82 = vector.broadcast %81 : f32 to vector<1x256xf32>
    %83 = arith.addf %80, %82 : vector<1x256xf32>
    %cst_50 = arith.constant 0.000000e+00 : f32
    %84 = vector.broadcast %cst_50 : f32 to vector<1x256xf32>
    %85 = arith.subf %84, %83 : vector<1x256xf32>
    %86 = math.exp %85 : vector<1x256xf32>
    %cst_51 = arith.constant 1.000000e+00 : f32
    %87 = vector.broadcast %cst_51 : f32 to vector<1x256xf32>
    %88 = arith.addf %87, %86 : vector<1x256xf32>
    %cst_52 = arith.constant 1.000000e+00 : f32
    %89 = vector.broadcast %cst_52 : f32 to vector<1x256xf32>
    %90 = arith.divf %89, %88 : vector<1x256xf32>
    %91 = arith.subf %1, %3 : vector<32x256xf32>
    %92 = vector.broadcast %90 : vector<1x256xf32> to vector<32x256xf32>
    %93 = arith.mulf %92, %91 : vector<32x256xf32>
    %94 = arith.addf %3, %93 : vector<32x256xf32>
    %95 = arith.addf %1, %94 : vector<32x256xf32>
    %cst_53 = arith.constant 5.000000e-01 : f32
    %96 = vector.broadcast %cst_53 : f32 to vector<32x256xf32>
    %97 = arith.mulf %95, %96 : vector<32x256xf32>
    %cst_54 = arith.constant 0.000000e+00 : f32
    %98 = vector.broadcast %cst_54 : f32 to vector<32x256xf32>
    %99 = arith.maximumf %97, %98 : vector<32x256xf32>
    %c0_55 = arith.constant 0 : index
    %c0_56 = arith.constant 0 : index
    %c0_57 = arith.constant 0 : index
    %100 = vector.load %arg16[%c0_55, %c0_56, %c0_57] : memref<1x32x256xf32, #tpu.memory_space<vmem>>, vector<1x32x256xf32>
    %101 = vector.shape_cast %100 : vector<1x32x256xf32> to vector<32x256xf32>
    %102 = vector.shape_cast %99 : vector<32x256xf32> to vector<1x32x256xf32>
    tpu.vector_store %arg16[%c0_55, %c0_56, %c0_57], %102 {strides = array<i32>} : memref<1x32x256xf32, #tpu.memory_space<vmem>>, vector<1x32x256xf32>,
    %103 = arith.addf %3, %94 : vector<32x256xf32>
    %cst_58 = arith.constant 5.000000e-01 : f32
    %104 = vector.broadcast %cst_58 : f32 to vector<32x256xf32>
    %105 = arith.mulf %103, %104 : vector<32x256xf32>
    %cst_59 = arith.constant 0.000000e+00 : f32
    %106 = vector.broadcast %cst_59 : f32 to vector<32x256xf32>
    %107 = arith.maximumf %105, %106 : vector<32x256xf32>
    %c0_60 = arith.constant 0 : index
    %c0_61 = arith.constant 0 : index
    %c0_62 = arith.constant 0 : index
    %108 = vector.load %arg17[%c0_60, %c0_61, %c0_62] : memref<1x32x256xf32, #tpu.memory_space<vmem>>, vector<1x32x256xf32>
    %109 = vector.shape_cast %108 : vector<1x32x256xf32> to vector<32x256xf32>
    %110 = vector.shape_cast %107 : vector<32x256xf32> to vector<1x32x256xf32>
    tpu.vector_store %arg17[%c0_60, %c0_61, %c0_62], %110 {strides = array<i32>} : memref<1x32x256xf32, #tpu.memory_space<vmem>>, vector<1x32x256xf32>,
    return
  }
  func.func @transform_0(%arg0: i32) -> (i32, i32, i32) {
    %c0_i32 = arith.constant 0 : i32
    %c0_i32_0 = arith.constant 0 : i32
    %c0_i32_1 = arith.constant 0 : i32
    return %arg0, %c0_i32, %c0_i32_0 : i32, i32, i32
  }
  func.func @transform_1(%arg0: i32) -> (i32, i32, i32) {
    %c0_i32 = arith.constant 0 : i32
    %c0_i32_0 = arith.constant 0 : i32
    %c0_i32_1 = arith.constant 0 : i32
    return %arg0, %c0_i32, %c0_i32_0 : i32, i32, i32
  }
  func.func @transform_2(%arg0: i32) -> (i32, i32) {
    %c0_i32 = arith.constant 0 : i32
    %c0_i32_0 = arith.constant 0 : i32
    %c0_i32_1 = arith.constant 0 : i32
    return %c0_i32, %c0_i32_0 : i32, i32
  }
  func.func @transform_3(%arg0: i32) -> (i32, i32) {
    %c0_i32 = arith.constant 0 : i32
    %c0_i32_0 = arith.constant 0 : i32
    %c0_i32_1 = arith.constant 0 : i32
    return %c0_i32, %c0_i32_0 : i32, i32
  }
  func.func @transform_4(%arg0: i32) -> (i32, i32) {
    %c0_i32 = arith.constant 0 : i32
    %c0_i32_0 = arith.constant 0 : i32
    %c0_i32_1 = arith.constant 0 : i32
    return %c0_i32, %c0_i32_0 : i32, i32
  }
  func.func @transform_5(%arg0: i32) -> (i32, i32) {
    %c0_i32 = arith.constant 0 : i32
    %c0_i32_0 = arith.constant 0 : i32
    %c0_i32_1 = arith.constant 0 : i32
    return %c0_i32, %c0_i32_0 : i32, i32
  }
  func.func @transform_6(%arg0: i32) -> (i32, i32) {
    %c0_i32 = arith.constant 0 : i32
    %c0_i32_0 = arith.constant 0 : i32
    %c0_i32_1 = arith.constant 0 : i32
    return %c0_i32, %c0_i32_0 : i32, i32
  }
  func.func @transform_7(%arg0: i32) -> (i32, i32) {
    %c0_i32 = arith.constant 0 : i32
    %c0_i32_0 = arith.constant 0 : i32
    %c0_i32_1 = arith.constant 0 : i32
    return %c0_i32, %c0_i32_0 : i32, i32
  }
  func.func @transform_8(%arg0: i32) -> (i32, i32) {
    %c0_i32 = arith.constant 0 : i32
    %c0_i32_0 = arith.constant 0 : i32
    %c0_i32_1 = arith.constant 0 : i32
    return %c0_i32, %c0_i32_0 : i32, i32
  }
  func.func @transform_9(%arg0: i32) -> (i32, i32) {
    %c0_i32 = arith.constant 0 : i32
    %c0_i32_0 = arith.constant 0 : i32
    %c0_i32_1 = arith.constant 0 : i32
    return %c0_i32, %c0_i32_0 : i32, i32
  }
  func.func @transform_10(%arg0: i32) -> (i32, i32) {
    %c0_i32 = arith.constant 0 : i32
    %c0_i32_0 = arith.constant 0 : i32
    %c0_i32_1 = arith.constant 0 : i32
    return %c0_i32, %c0_i32_0 : i32, i32
  }
  func.func @transform_11(%arg0: i32) -> (i32, i32) {
    %c0_i32 = arith.constant 0 : i32
    %c0_i32_0 = arith.constant 0 : i32
    %c0_i32_1 = arith.constant 0 : i32
    return %c0_i32, %c0_i32_0 : i32, i32
  }
  func.func @transform_12(%arg0: i32) -> (i32, i32) {
    %c0_i32 = arith.constant 0 : i32
    %c0_i32_0 = arith.constant 0 : i32
    %c0_i32_1 = arith.constant 0 : i32
    return %c0_i32, %c0_i32_0 : i32, i32
  }
  func.func @transform_13(%arg0: i32) -> (i32, i32) {
    %c0_i32 = arith.constant 0 : i32
    %c0_i32_0 = arith.constant 0 : i32
    %c0_i32_1 = arith.constant 0 : i32
    return %c0_i32, %c0_i32_0 : i32, i32
  }
  func.func @transform_14(%arg0: i32) -> i32 {
    %c0_i32 = arith.constant 0 : i32
    %c0_i32_0 = arith.constant 0 : i32
    return %c0_i32 : i32
  }
  func.func @transform_15(%arg0: i32) -> (i32, i32, i32) {
    %c0_i32 = arith.constant 0 : i32
    %c0_i32_0 = arith.constant 0 : i32
    %c0_i32_1 = arith.constant 0 : i32
    return %arg0, %c0_i32, %c0_i32_0 : i32, i32, i32
  }
  func.func @transform_16(%arg0: i32) -> (i32, i32, i32) {
    %c0_i32 = arith.constant 0 : i32
    %c0_i32_0 = arith.constant 0 : i32
    %c0_i32_1 = arith.constant 0 : i32
    return %arg0, %c0_i32, %c0_i32_0 : i32, i32, i32
  }
}

</mosaic_0001>

<bundles_post_ra>
// kernel: tpu_custom_call.1
= control target key start
LH: loop header
LB: loop body
LE: loop exit
PB: predicated region body
PF: predicated region fallthrough
CT: control target
= control target key end

     0   :  { %s1860_s0 = inlined_call_operand.vmem [shape: f32[2,32,256], index: 0, kind: input, shape index: {}]   ;;  %s1861_s1 = inlined_call_operand.vmem [shape: f32[2,32,256], index: 1, kind: input, shape index: {}]   ;;  %s1862_s2 = inlined_call_operand.vmem [shape: f32[32,2], index: 2, kind: input, shape index: {}]   ;;  %s1863_s3 = inlined_call_operand.vmem [shape: f32[32,2], index: 3, kind: input, shape index: {}]   ;;  %s1864_s4 = inlined_call_operand.vmem [shape: f32[1,2], index: 4, kind: input, shape index: {}]   ;;  %s1865_s5 = inlined_call_operand.vmem [shape: f32[32,2], index: 5, kind: input, shape index: {}]   ;;  %s1866_s6 = inlined_call_operand.vmem [shape: f32[32,1], index: 6, kind: input, shape index: {}]   ;;  %s1867_s7 = inlined_call_operand.vmem [shape: f32[32,2], index: 7, kind: input, shape index: {}]   ;;  %s1868_s8 = inlined_call_operand.vmem [shape: f32[32,2], index: 8, kind: input, shape index: {}]   ;;  %s1869_s9 = inlined_call_operand.vmem [shape: f32[1,2], index: 9, kind: input, shape index: {}]   ;;  %s1870_s10 = inlined_call_operand.vmem [shape: f32[32,2], index: 10, kind: input, shape index: {}]   ;;  %s1871_s11 = inlined_call_operand.vmem [shape: f32[32,1], index: 11, kind: input, shape index: {}]   ;;  %s1872_s12 = inlined_call_operand.vmem [shape: f32[32,1], index: 12, kind: input, shape index: {}]   ;;  %s1873_s13 = inlined_call_operand.vmem [shape: f32[32,1], index: 13, kind: input, shape index: {}]   ;;  %s1874_s14 = inlined_call_operand.<no memory space> [shape: f32[1], index: 14, kind: input, shape index: {}]   ;;  %s1875_s15 = inlined_call_operand.hbm [shape: f32[2,32,256], index: 15, kind: output, shape index: {0}]   ;;  %s1876_s16 = inlined_call_operand.hbm [shape: f32[2,32,256], index: 16, kind: output, shape index: {1}]  }
   0x1   :  { %1881 = sst [smem:[#allocation12_spill]] %s1860_s0 }
   0x2   :  { %1882 = sst [smem:[#allocation13_spill]] %s1861_s1 }
   0x3   :  { %1883 = sst [smem:[#allocation14_spill]] %s1862_s2 }
   0x4   :  { %22 = sst [smem:[#allocation2]] %s1874_s14 }
   0x5   :  { %23 = vsyncpa [#allocation4], 0 }
   0x6   :  { %25 = vsyncpa [#allocation4 + $0x1], 0 }
   0x7   :  { %26 = vsyncpa [#allocation6], 0 }
   0x8   :  { %28 = vsyncpa [#allocation6 + $0x1], 0  ;;  %s1436_s23 = smov 0   ;;  %s1438_s24 = smov 0  }
   0x9   :  { %s1440_s25 = smov 0   ;;  %s1442_s26 = smov 0  }
   0xa LB: > { %1884 = sst [smem:[#allocation9_spill]] %s1337_s25  ;;  %s1457_s14 = sadd.s32 4294967295, %s1341_s26   ;;  %s1341_s26 = sphi %s1442_s26, %s1896_s26   ;;  %s1337_s25 = sphi %s1440_s25, %s1898_s25   ;;  %s1333_s24 = sphi %s1438_s24, %s1900_s24   ;;  %s1329_s23 = sphi %s1436_s23, %s1899_s23  }
   0xb   : > { %s1136_s27 = sadd.s32 4294967294, %s1341_s26   ;;  %s1461_s28 = sadd.s32 1, %s1341_s26  }
   0xc   : > { %1885 = sst [smem:[#allocation10_spill]] %s1461_s28  ;;  %s366_s29 = sadd.s32 1, %s1337_s25 }
   0xd   : > { %s363_s30 = ssub.s32 %s1341_s26, %s1461_s28  ;;  %p376_p0 = scmp.ne.s32.totalorder %s1337_s25, %s1333_s24 }
   0xe   : > { %p364_p1 = scmp.eq.s32.totalorder %s363_s30, 0  ;;  %p377_p2 = scmp.eq.s32.totalorder %s1457_s14, 1 }
   0xf   : > { %p382_p3 = scmp.ne.s32.totalorder %s1333_s24, %s1329_s23  ;;  %p383_p4 = scmp.eq.s32.totalorder %s1136_s27, 1 }
  0x10   : > { %s1472_s0 = scalar_select %p364_p1, %s1337_s25, %s366_s29  }
  0x11   : > { %p1474_p5 = por %p377_p2, %p376_p0  ;;  %p1478_p6 = por %p383_p4, %p382_p3 }
  0x12   : > { %1886 = sst [smem:[#allocation11_spill]] %s1472_s0  ;;  %p1139_p7 = scmp.ge.s32.totalorder %s1341_s26, 1 }
  0x13   : > { %p482_p8 = scmp.lt.s32.totalorder %s1341_s26, 3 }
  0x15   : > { %p483_p9 = pnand %p1139_p7, %p482_p8 }
  0x16   : > { %p542_p10 = scmp.lt.s32.totalorder (!%p483_p9), %s1457_s14, 1  ;;  %s1889_s1 = sld [smem:[#allocation13_spill]] (!%p483_p9)  ;;  %v701_v28 = vld [vmem:[%s1868_s8] sm:$0xff] (!%p483_p9)  ;;  %v702_v33 = vld [vmem:[%s1868_s8 + $0x8] sm:$0xff] (!%p483_p9)  ;;  %v703_v49 = vld [vmem:[%s1868_s8 + $0x10] sm:$0xff] (!%p483_p9)  ;;  %vm620_vm0 = vcmask (!%p483_p9), 15360  }
  0x17   : > { %486 = sbr.rel (%p483_p9) target bundleno = 663 (0x297), region = 80  ;;  %s1890_s0 = sld [smem:[#allocation12_spill]] (!%p483_p9)  ;;  %v608_v29 = vld [vmem:[%s1863_s3] sm:$0xff] (!%p483_p9)  ;;  %v609_v36 = vld [vmem:[%s1863_s3 + $0x8] sm:$0xff] (!%p483_p9)  ;;  %v610_v52 = vld [vmem:[%s1863_s3 + $0x10] sm:$0xff] (!%p483_p9) }
  0x18   : > { %s1891_s2 = sld [smem:[#allocation14_spill]] (!%p483_p9)  ;;  %v693_v31 = vld [vmem:[%s1867_s7] sm:$0xff] (!%p483_p9)  ;;  %v694_v37 = vld [vmem:[%s1867_s7 + $0x8] sm:$0xff] (!%p483_p9)  ;;  %v695_v53 = vld [vmem:[%s1867_s7 + $0x10] sm:$0xff] (!%p483_p9)  ;;  %s891_s22 = sld [smem:[#allocation2]] (!%p483_p9) }
  0x19   : > { %s1880_s30 = sshll.u32 (!%p483_p9), %s1457_s14, 10 }
  0x1a   : > { %s1745_s21 = scalar_lea.hbm (!%p483_p9), %s1875_s15, %s1880_s30 }
  0x1e   : > { %s543_s19 = scalar_select %p542_p10, %s1457_s14, 1  ;;  %v600_v27 = vld [vmem:[%s1891_s2] sm:$0xff]  ;;  %v601_v32 = vld [vmem:[%s1891_s2 + $0x8] sm:$0xff]  ;;  %v602_v48 = vld [vmem:[%s1891_s2 + $0x10] sm:$0xff] }
  0x20   : > { %s1154_s20 = sshll.u32 %s543_s19, 6 }
  0x21   : > { %s551_s27 = scalar_lea.vmem %s1889_s1, %s1154_s20  ;;  %s546_s25 = scalar_lea.vmem %s1890_s0, %s1154_s20 }
  0x22   : > { %v1492_v0 = vld [vmem:[%s551_s27] sm:$0xff]  ;;  %v1494_v1 = vld [vmem:[%s551_s27 + $0x8] sm:$0xff]  ;;  %v1502_v5 = vld [vmem:[%s551_s27 + $0x10] sm:$0xff] }
  0x23   : > { %v1496_v2 = vld [vmem:[%s546_s25] sm:$0xff]  ;;  %v584_v3 = vadd.f32 %v1494_v1, %v1492_v0  ;;  %v1500_v4 = vld [vmem:[%s546_s25 + $0x8] sm:$0xff]  ;;  %v1504_v6 = vld [vmem:[%s551_s27 + $0x18] sm:$0xff] }
  0x24   : > { %v568_v7 = vadd.f32 %v1500_v4, %v1496_v2  ;;  %v1508_v8 = vld [vmem:[%s546_s25 + $0x10] sm:$0xff]  ;;  %v1510_v9 = vld [vmem:[%s546_s25 + $0x18] sm:$0xff]  ;;  %v587_v10 = vadd.f32 %v1504_v6, %v1502_v5  ;;  %v1516_v12 = vld [vmem:[%s551_s27 + $0x20] sm:$0xff] }
  0x25   : > { %585 = vadd.xlane.f32.xlu1 %v584_v3  ;;  %v571_v11 = vadd.f32 %v1510_v9, %v1508_v8  ;;  %v1518_v13 = vld [vmem:[%s551_s27 + $0x28] sm:$0xff]  ;;  %v1520_v14 = vld [vmem:[%s546_s25 + $0x20] sm:$0xff]  ;;  %v1528_v18 = vld [vmem:[%s551_s27 + $0x30] sm:$0xff] }
  0x26   : > { %569 = vadd.xlane.f32.xlu0 %v568_v7  ;;  %v1522_v15 = vld [vmem:[%s546_s25 + $0x28] sm:$0xff]  ;;  %v590_v16 = vadd.f32 %v1518_v13, %v1516_v12  ;;  %v1530_v19 = vld [vmem:[%s551_s27 + $0x38] sm:$0xff]  ;;  %v1532_v20 = vld [vmem:[%s546_s25 + $0x30] sm:$0xff]  ;;  %s1707_s27 = sand.u32 1, %s1333_s24  }
  0x27   : > { %v574_v17 = vadd.f32 %v1522_v15, %v1520_v14  ;;  %v1534_v21 = vld [vmem:[%s546_s25 + $0x38] sm:$0xff]  ;;  %v593_v22 = vadd.f32 %v1530_v19, %v1528_v18  ;;  %s1140_s29 = sshll.u32 %s1707_s27, 6 }
  0x28   : > { %v577_v23 = vadd.f32 %v1534_v21, %v1532_v20  ;;  %v603_v3 = vld [vmem:[%s1891_s2 + $0x18] sm:$0xff]  ;;  %s1737_s0 = scalar_lea.vmem [#allocation3], %s1140_s29  ;;  %s1767_s1 = scalar_lea.vmem [#allocation5], %s1140_s29 }
  0x29   : > { %588 = vadd.xlane.f32.xlu1 %v587_v10  ;;  %v704_v7 = vld [vmem:[%s1868_s8 + $0x18] sm:$0xff]  ;;  %s1014_s19 = sshll.u32 %s1737_s0, 4  ;;  %s1747_s19 = int_to_ptr.vmem [resolvable:$true] %s1014_s19 }
  0x2a   : > { %572 = vadd.xlane.f32.xlu0 %v571_v11  ;;  %s1247_s20 = scalar_lea.vmem %s1747_s19, 1024 }
  0x2b   : > { %p1248_p11 = scmp.ne.s32.totalorder %s1747_s19, %s1247_s20 }
  0x2d   : > { %591 = vadd.xlane.f32.xlu1 %v590_v16  ;;  %p1249_p12 = pnand %p1248_p11, %p1474_p5 }
  0x2e   : > { %575 = vadd.xlane.f32.xlu0 %v574_v17  ;;  %v611_v17 = vld [vmem:[%s1863_s3 + $0x18] sm:$0xff] }
  0x2f   : > { %p1250_p13 = pneg %p1249_p12 }
  0x31   : > { %594 = vadd.xlane.f32.xlu1 %v593_v22  ;;  %v696_v22 = vld [vmem:[%s1867_s7 + $0x18] sm:$0xff] }
  0x32   : > { %578 = vadd.xlane.f32.xlu0 %v577_v23 }
  0xb2   : > { %v586_v24 = vpop.xlane.xlu1 %585 }
  0xb3   : > { %v570_v25 = vpop.xlane.xlu0 %569  ;;  %v596_v26 = vmul.f32 0.00390625, %v586_v24 }
  0xb4   : > { %v580_v30 = vmul.f32 0.00390625, %v570_v25 }
  0xb5   : > { %v604_v39 = vmul.f32 %v600_v27, %v596_v26  ;;  %v705_v40 = vmul.f32 %v701_v28, %v596_v26 }
  0xb6   : > { %v589_v34 = vpop.xlane.xlu1 %588  ;;  %v612_v42 = vmul.f32 %v608_v29, %v580_v30  ;;  %v697_v43 = vmul.f32 %v693_v31, %v580_v30 }
  0xb7   : > { %v597_v35 = vmul.f32 0.00390625, %v589_v34  ;;  %v573_v38 = vpop.xlane.xlu0 %572 }
  0xb8   : > { %v581_v41 = vmul.f32 0.00390625, %v573_v38  ;;  %v616_v58 = vadd.f32 %v612_v42, %v604_v39  ;;  %v709_v59 = vadd.f32 %v705_v40, %v697_v43 }
  0xb9   : > { %v605_v44 = vmul.f32 %v601_v32, %v597_v35  ;;  %v706_v45 = vmul.f32 %v702_v33, %v597_v35 }
  0xba   : > { %v613_v46 = vmul.f32 %v609_v36, %v581_v41  ;;  %v698_v47 = vmul.f32 %v694_v37, %v581_v41  ;;  %v592_v50 = vpop.xlane.xlu1 %591  ;;  %v621_v28 = vsel %vm620_vm0, %v616_v58, 0.0  ;;  %v713_v29 = vsel %vm620_vm0, %v709_v59, 0.0  ;;  %v634_v58 = vld [vmem:[%s1864_s4] sm:$0x1] }
  0xbb   : > { %v598_v51 = vmul.f32 0.00390625, %v592_v50  ;;  %v576_v54 = vpop.xlane.xlu0 %575  ;;  %v726_v59 = vld [vmem:[%s1869_s9] sm:$0x1] }
  0xbc   : > { %v617_v55 = vadd.f32 %v613_v46, %v605_v44  ;;  %v710_v56 = vadd.f32 %v706_v45, %v698_v47  ;;  %v582_v57 = vmul.f32 0.00390625, %v576_v54 }
  0xbd   : > { %v606_v60 = vmul.f32 %v602_v48, %v598_v51  ;;  %v707_v61 = vmul.f32 %v703_v49, %v598_v51 }
  0xbe   : > { %v614_v62 = vmul.f32 %v610_v52, %v582_v57  ;;  %v699_v63 = vmul.f32 %v695_v53, %v582_v57  ;;  %v595_v10 = vpop.xlane.xlu1 %594  ;;  %v622_v11 = vsel %vm620_vm0, %v617_v55, 0.0  ;;  %v714_v24 = vsel %vm620_vm0, %v710_v56, 0.0 }
  0xbf   : > { %v599_v16 = vmul.f32 0.00390625, %v595_v10  ;;  %v579_v23 = vpop.xlane.xlu0 %578  ;;  %v623_v36 = vadd.f32 %v622_v11, %v621_v28  ;;  %v715_v37 = vadd.f32 %v714_v24, %v713_v29  ;;  %v641_v52 = vlaneseq  ;;  %v638_v11 = vld [vmem:[%s1865_s5 + $0x8] sm:$0xff]  ;;  %v729_v24 = vld [vmem:[%s1870_s10] sm:$0xff] }
  0xc0   : > { %v618_v25 = vadd.f32 %v614_v62, %v606_v60  ;;  %v711_v26 = vadd.f32 %v707_v61, %v699_v63  ;;  %v583_v27 = vmul.f32 0.00390625, %v579_v23  ;;  %v730_v23 = vld [vmem:[%s1870_s10 + $0x8] sm:$0xff] }
  0xc1   : > { %v607_v30 = vmul.f32 %v603_v3, %v599_v16  ;;  %v708_v31 = vmul.f32 %v704_v7, %v599_v16  ;;  %v642_v57 = vshrl.u32 %v641_v52, 7  ;;  %v637_v16 = vld [vmem:[%s1865_s5] sm:$0xff]  ;;  %v754_v52 = vld [vmem:[%s1871_s11 + $0x8] sm:$0xff] }
  0xc2   : > { %v624_v32 = vsel %vm620_vm0, %v618_v25, 0.0  ;;  %v716_v33 = vsel %vm620_vm0, %v711_v26, 0.0  ;;  %v615_v34 = vmul.f32 %v611_v17, %v583_v27  ;;  %v700_v35 = vmul.f32 %v696_v22, %v583_v27 }
  0xc3   : > { %v625_v40 = vadd.f32 %v624_v32, %v623_v36  ;;  %v717_v41 = vadd.f32 %v716_v33, %v715_v37  ;;  %v643_v63 = vsub.s32 0, %v642_v57  ;;  %v639_v32 = vld [vmem:[%s1865_s5 + $0x10] sm:$0xff]  ;;  %v732_v37 = vld [vmem:[%s1870_s10 + $0x18] sm:$0xff] }
  0xc4   : > { %v619_v38 = vadd.f32 %v615_v34, %v607_v30  ;;  %v712_v39 = vadd.f32 %v708_v31, %v700_v35  ;;  %v731_v31 = vld [vmem:[%s1870_s10 + $0x10] sm:$0xff] }
  0xc6   : > { %v626_v42 = vsel %vm620_vm0, %v619_v38, 0.0  ;;  %v718_v43 = vsel %vm620_vm0, %v712_v39, 0.0  ;;  %v640_v38 = vld [vmem:[%s1865_s5 + $0x18] sm:$0xff] }
  0xc7   : > { %v627_v44 = vadd.f32 %v626_v42, %v625_v40  ;;  %v719_v45 = vadd.f32 %v718_v43, %v717_v41 }
  0xc9   : > { %v628_v46 = vrot.slane %v627_v44, 4  ;;  %v720_v47 = vrot.slane %v719_v45, 4 }
  0xcb   : > { %v629_v48 = vadd.f32 %v628_v46, %v627_v44  ;;  %v721_v49 = vadd.f32 %v720_v47, %v719_v45  ;;  %v1343_v45 = vmov 0   ;;  %v662_v46 = vld [vmem:[%s1866_s6 + $0x8] sm:$0xff]  ;;  %v661_v47 = vld [vmem:[%s1866_s6] sm:$0xff] }
  0xcc   : > { %1206 = vset.pattern.permute.xlu1 %v1343_v45  ;;  %1205 = vset.pattern.permute.xlu0 %v1343_v45 }
  0xcd   : > { %v630_v50 = vrot.slane %v629_v48, 2  ;;  %v722_v51 = vrot.slane %v721_v49, 2 }
  0xcf   : > { %v631_v53 = vadd.f32 %v630_v50, %v629_v48  ;;  %v723_v54 = vadd.f32 %v722_v51, %v721_v49 }
  0xd1   : > { %v632_v55 = vrot.slane %v631_v53, 1  ;;  %v724_v56 = vrot.slane %v723_v54, 1 }
  0xd3   : > { %v633_v60 = vadd.f32 %v632_v55, %v631_v53  ;;  %v725_v61 = vadd.f32 %v724_v56, %v723_v54  ;;  %v753_v53 = vld [vmem:[%s1871_s11] sm:$0xff] }
  0xd5   : > { %v635_v62 = vadd.f32 %v634_v58, %v633_v60  ;;  %v727_v3 = vadd.f32 %v726_v59, %v725_v61 }
  0xd7   : > { %v636_v7 = vmax.f32 %v635_v62, 0.0  ;;  %v728_v10 = vmax.f32 %v727_v3, 0.0  ;;  %v755_v62 = vld [vmem:[%s1871_s11 + $0x10] sm:$0xff] }
  0xd9   : > { %v644_v17 = vrot.slane %v636_v7, %v643_v63  ;;  %v736_v22 = vrot.slane %v728_v10, %v643_v63  ;;  %v663_v63 = vld [vmem:[%s1866_s6 + $0x10] sm:$0xff] }
  0xdb   : > { %v646_v25 = vmul.f32 %v644_v17, %v638_v11  ;;  %v645_v26 = vmul.f32 %v644_v17, %v637_v16  ;;  %v738_v29 = vmul.f32 %v736_v22, %v730_v23  ;;  %v737_v30 = vmul.f32 %v736_v22, %v729_v24  ;;  %v756_v24 = vld [vmem:[%s1871_s11 + $0x18] sm:$0xff] }
  0xdc   : > { %v739_v35 = vmul.f32 %v736_v22, %v731_v31  ;;  %v647_v36 = vmul.f32 %v644_v17, %v639_v32  ;;  %v740_v41 = vmul.f32 %v736_v22, %v732_v37  ;;  %v648_v42 = vmul.f32 %v644_v17, %v640_v38 }
  0xdd   : > { %v652_v27 = vsel %vm620_vm0, %v646_v25, 0.0  ;;  %v649_v28 = vsel %vm620_vm0, %v645_v26, 0.0  ;;  %v744_v33 = vsel %vm620_vm0, %v738_v29, 0.0  ;;  %v741_v34 = vsel %vm620_vm0, %v737_v30, 0.0 }
  0xde   : > { %653 = vadd.xlane.f32.xlu1 %v652_v27  ;;  %650 = vadd.xlane.f32.xlu0 %v649_v28  ;;  %v747_v39 = vsel %vm620_vm0, %v739_v35, 0.0  ;;  %v655_v40 = vsel %vm620_vm0, %v647_v36, 0.0  ;;  %v750_v43 = vsel %vm620_vm0, %v740_v41, 0.0  ;;  %v658_v44 = vsel %vm620_vm0, %v648_v42, 0.0  ;;  %v664_v28 = vld [vmem:[%s1866_s6 + $0x18] sm:$0xff] }
  0xe2   : > { %745 = vadd.xlane.f32.xlu1 %v744_v33  ;;  %742 = vadd.xlane.f32.xlu0 %v741_v34 }
  0xe6   : > { %748 = vadd.xlane.f32.xlu1 %v747_v39  ;;  %656 = vadd.xlane.f32.xlu0 %v655_v40 }
  0xea   : > { %751 = vadd.xlane.f32.xlu1 %v750_v43  ;;  %659 = vadd.xlane.f32.xlu0 %v658_v44 }
 0x16b   : > { %v654_v48 = vpop.xlane.xlu1 %653  ;;  %v651_v49 = vpop.xlane.xlu0 %650 }
 0x16c   : > { %v666_v50 = vadd.f32 %v662_v46, %v654_v48  ;;  %v665_v51 = vadd.f32 %v661_v47, %v651_v49 }
 0x16e   : > { %v670_v54 = vsub.f32 0.0, %v666_v50  ;;  %v669_v55 = vsub.f32 0.0, %v665_v51 }
 0x16f   : > { %v746_v56 = vpop.xlane.xlu1 %745  ;;  %v743_v57 = vpop.xlane.xlu0 %742 }
 0x170   : > { %v673_v58 = vmul.f32 1.442695, %v669_v55  ;;  %v758_v59 = vadd.f32 %v754_v52, %v746_v56  ;;  %v757_v60 = vadd.f32 %v753_v53, %v743_v57  ;;  %v675_v61 = vmul.f32 1.442695, %v670_v54  ;;  %v790_v53 = vld [vmem:[%s1873_s13 + $0x8] sm:$0xff]  ;;  %v785_v54 = vld [vmem:[%s1872_s12] sm:$0xff] }
 0x171   : > { %v789_v57 = vld [vmem:[%s1873_s13] sm:$0xff] }
 0x172   : > { %v762_v3 = vsub.f32 0.0, %v758_v59  ;;  %v761_v7 = vsub.f32 0.0, %v757_v60  ;;  %1207 = vpow2.f32 %v673_v58  ;;  %v786_v59 = vld [vmem:[%s1872_s12 + $0x8] sm:$0xff] }
 0x173   : > { %v749_v10 = vpop.xlane.xlu1 %748  ;;  %v657_v11 = vpop.xlane.xlu0 %656  ;;  %1209 = vpow2.f32 %v675_v61 }
 0x174   : > { %v767_v16 = vmul.f32 1.442695, %v762_v3  ;;  %v765_v17 = vmul.f32 1.442695, %v761_v7  ;;  %v759_v22 = vadd.f32 %v755_v62, %v749_v10  ;;  %v667_v23 = vadd.f32 %v663_v63, %v657_v11 }
 0x176   : > { %1211 = vpow2.f32 %v767_v16  ;;  %v763_v25 = vsub.f32 0.0, %v759_v22  ;;  %v671_v26 = vsub.f32 0.0, %v667_v23  ;;  %v791_v22 = vld [vmem:[%s1873_s13 + $0x10] sm:$0xff] }
 0x177   : > { %1213 = vpow2.f32 %v765_v17  ;;  %v752_v27 = vpop.xlane.xlu1 %751  ;;  %v660_v29 = vpop.xlane.xlu0 %659 }
 0x178   : > { %v769_v30 = vmul.f32 1.442695, %v763_v25  ;;  %v760_v31 = vadd.f32 %v756_v24, %v752_v27  ;;  %v677_v32 = vmul.f32 1.442695, %v671_v26  ;;  %v668_v34 = vadd.f32 %v664_v28, %v660_v29  ;;  %v787_v26 = vld [vmem:[%s1872_s12 + $0x10] sm:$0xff] }
 0x17a   : > { %1215 = vpow2.f32 %v769_v30  ;;  %v764_v33 = vsub.f32 0.0, %v760_v31  ;;  %v672_v38 = vsub.f32 0.0, %v668_v34  ;;  %v792_v30 = vld [vmem:[%s1873_s13 + $0x18] sm:$0xff] }
 0x17b   : > { %1217 = vpow2.f32 %v677_v32  ;;  %v788_v34 = vld [vmem:[%s1872_s12 + $0x18] sm:$0xff] }
 0x17c   : > { %v1208_v35 = vpop.eup %1207  ;;  %v771_v36 = vmul.f32 1.442695, %v764_v33  ;;  %v679_v44 = vmul.f32 1.442695, %v672_v38 }
 0x17d   : > { %v681_v37 = vadd.f32 1.0, %v1208_v35  ;;  %v1210_v39 = vpop.eup %1209 }
 0x17e   : > { %1219 = vpow2.f32 %v771_v36  ;;  %v682_v45 = vadd.f32 1.0, %v1210_v39 }
 0x17f   : > { %1221 = vrcp.f32 %v681_v37 }
 0x180   : > { %v1212_v40 = vpop.eup %1211 }
 0x181   : > { %v1214_v41 = vpop.eup %1213  ;;  %v774_v42 = vadd.f32 1.0, %v1212_v40 }
 0x182   : > { %v773_v43 = vadd.f32 1.0, %v1214_v41 }
 0x183   : > { %1223 = vrcp.f32 %v774_v42 }
 0x184   : > { %v1216_v46 = vpop.eup %1215  ;;  %1225 = vrcp.f32 %v773_v43 }
 0x185   : > { %1227 = vpow2.f32 %v679_v44  ;;  %v775_v47 = vadd.f32 1.0, %v1216_v46  ;;  %v1218_v48 = vpop.eup %1217 }
 0x186   : > { %1229 = vrcp.f32 %v682_v45  ;;  %v683_v50 = vadd.f32 1.0, %v1218_v48 }
 0x187   : > { %1231 = vrcp.f32 %v775_v47 }
 0x188   : > { %v1220_v49 = vpop.eup %1219  ;;  %1233 = vrcp.f32 %v683_v50 }
 0x189   : > { %v1222_v51 = vpop.eup %1221  ;;  %v776_v58 = vadd.f32 1.0, %v1220_v49 }
 0x18a   : > { %v801_v63 = vmul.f32 %v1222_v51, %v785_v54 }
 0x18b   : > { %1235 = vrcp.f32 %v776_v58 }
 0x18c   : > { %v805_v11 = vadd.f32 %v801_v63, %v789_v57 }
 0x18d   : > { %v1224_v52 = vpop.eup %1223 }
 0x18e   : > { %v1226_v55 = vpop.eup %1225  ;;  %v794_v56 = vmul.f32 %v1224_v52, %v790_v53 }
 0x18f   : > { %v793_v60 = vmul.f32 %v1226_v55, %v789_v57  ;;  %v1228_v61 = vpop.eup %1227 }
 0x190   : > { %v798_v62 = vadd.f32 %v794_v56, %v786_v59  ;;  %v1230_v3 = vpop.eup %1229  ;;  %v684_v10 = vadd.f32 1.0, %v1228_v61 }
 0x191   : > { %v797_v7 = vadd.f32 %v793_v60, %v785_v54  ;;  %v802_v16 = vmul.f32 %v1230_v3, %v786_v59  ;;  %v1232_v17 = vpop.eup %1231 }
 0x192   : > { %816 = vperm.xlu1 %1206, %v798_v62   ;;  %1237 = vrcp.f32 %v684_v10  ;;  %v795_v24 = vmul.f32 %v1232_v17, %v791_v22  ;;  %v1234_v25 = vpop.eup %1233 }
 0x193   : > { %811 = vperm.xlu0 %1205, %v797_v7   ;;  %v806_v23 = vadd.f32 %v802_v16, %v790_v53  ;;  %v803_v28 = vmul.f32 %v1234_v25, %v787_v26 }
 0x194   : > { %v799_v27 = vadd.f32 %v795_v24, %v787_v26 }
 0x195   : > { %v1236_v29 = vpop.eup %1235  ;;  %v807_v31 = vadd.f32 %v803_v28, %v791_v22 }
 0x196   : > { %839 = vperm.xlu1 %1206, %v805_v11   ;;  %v796_v32 = vmul.f32 %v1236_v29, %v792_v30 }
 0x198   : > { %v800_v35 = vadd.f32 %v796_v32, %v788_v34 }
 0x19a   : > { %844 = vperm.xlu1 %1206, %v806_v23  }
 0x19c   : > { %v1238_v33 = vpop.eup %1237 }
 0x19d   : > { %v804_v36 = vmul.f32 %v1238_v33, %v788_v34 }
 0x19e   : > { %821 = vperm.xlu1 %1206, %v799_v27  }
 0x19f   : > { %v808_v37 = vadd.f32 %v804_v36, %v792_v30 }
 0x1a2   : > { %849 = vperm.xlu1 %1206, %v807_v31  }
 0x1a6   : > { %826 = vperm.xlu1 %1206, %v800_v35  }
 0x1aa   : > { %854 = vperm.xlu1 %1206, %v808_v37  }
 0x211   : > { %v817_v38 = vpop.permute.xlu1 %816 }
 0x212   : > { %v812_v45 = vpop.permute.xlu0 %811  ;;  %v831_v46 = vmul.f32 %v817_v38, %v1508_v8  ;;  %v832_v47 = vmul.f32 %v817_v38, %v1510_v9  ;;  %v892_v38 = vstv %s891_s22 }
 0x213   : > { %v829_v52 = vmul.f32 %v812_v45, %v1496_v2  ;;  %v830_v53 = vmul.f32 %v812_v45, %v1500_v4 }
 0x215   : > { %v840_v39 = vpop.permute.xlu1 %839 }
 0x216   : > { %v857_v48 = vmul.f32 %v840_v39, %v1492_v0  ;;  %v858_v49 = vmul.f32 %v840_v39, %v1494_v1 }
 0x218   : > { %v865_v59 = vadd.f32 %v857_v48, %v829_v52  ;;  %v866_v60 = vadd.f32 %v858_v49, %v830_v53  ;;  %v909_v52 = vsub.f32 %v1508_v8, %v1502_v5  ;;  %v911_v53 = vsub.f32 %v1520_v14, %v1516_v12 }
 0x219   : > { %v845_v40 = vpop.permute.xlu1 %844 }
 0x21a   : > { %v859_v42 = vmul.f32 %v845_v40, %v1502_v5  ;;  %v860_v43 = vmul.f32 %v845_v40, %v1504_v6 }
 0x21c   : > { %v867_v54 = vadd.f32 %v859_v42, %v831_v46  ;;  %v868_v55 = vadd.f32 %v860_v43, %v832_v47 }
 0x21d   : > { %v822_v41 = vpop.permute.xlu1 %821 }
 0x21e   : > { %v833_v57 = vmul.f32 %v822_v41, %v1520_v14  ;;  %v834_v58 = vmul.f32 %v822_v41, %v1522_v15  ;;  %v873_v63 = vadd.f32 %v867_v54, %v865_v59  ;;  %v882_v3 = vadd.f32 %v868_v55, %v866_v60 }
 0x21f   : > { %v913_v54 = vsub.f32 %v1532_v20, %v1528_v18  ;;  %v908_v55 = vsub.f32 %v1500_v4, %v1494_v1 }
 0x221   : > { %v850_v44 = vpop.permute.xlu1 %849 }
 0x222   : > { %v861_v50 = vmul.f32 %v850_v44, %v1516_v12  ;;  %v862_v51 = vmul.f32 %v850_v44, %v1518_v13 }
 0x224   : > { %v869_v61 = vadd.f32 %v861_v50, %v833_v57  ;;  %v870_v62 = vadd.f32 %v862_v51, %v834_v58  ;;  %v907_v51 = vsub.f32 %v1496_v2, %v1492_v0  ;;  %v912_v57 = vsub.f32 %v1522_v15, %v1518_v13 }
 0x225   : > { %v827_v56 = vpop.permute.xlu1 %826  ;;  %v914_v58 = vsub.f32 %v1534_v21, %v1530_v19 }
 0x226   : > { %v835_v10 = vmul.f32 %v827_v56, %v1532_v20  ;;  %v836_v11 = vmul.f32 %v827_v56, %v1534_v21  ;;  %v874_v22 = vadd.f32 %v873_v63, %v869_v61  ;;  %v883_v23 = vadd.f32 %v882_v3, %v870_v62 }
 0x227   : > { %v910_v56 = vsub.f32 %v1510_v9, %v1504_v6 }
 0x229   : > { %v855_v7 = vpop.permute.xlu1 %854 }
 0x22a   : > { %v863_v16 = vmul.f32 %v855_v7, %v1528_v18  ;;  %v864_v17 = vmul.f32 %v855_v7, %v1530_v19 }
 0x22c   : > { %v871_v24 = vadd.f32 %v863_v16, %v835_v10  ;;  %v872_v25 = vadd.f32 %v864_v17, %v836_v11 }
 0x22e   : > { %v875_v26 = vadd.f32 %v874_v22, %v871_v24  ;;  %v884_v27 = vadd.f32 %v883_v23, %v872_v25 }
 0x230   : > { %v876_v28 = vrot.slane %v875_v26, 4  ;;  %v885_v29 = vrot.slane %v884_v27, 4 }
 0x232   : > { %v877_v30 = vadd.f32 %v876_v28, %v875_v26  ;;  %v886_v31 = vadd.f32 %v885_v29, %v884_v27 }
 0x234   : > { %v878_v32 = vrot.slane %v877_v30, 2  ;;  %v887_v33 = vrot.slane %v886_v31, 2 }
 0x236   : > { %v879_v34 = vadd.f32 %v878_v32, %v877_v30  ;;  %v888_v35 = vadd.f32 %v887_v33, %v886_v31 }
 0x238   : > { %v880_v36 = vrot.slane %v879_v34, 1  ;;  %v889_v37 = vrot.slane %v888_v35, 1 }
 0x23a   : > { %v881_v39 = vadd.f32 %v880_v36, %v879_v34  ;;  %v890_v40 = vadd.f32 %v889_v37, %v888_v35 }
 0x23c   : > { %v893_v41 = vadd.f32 %v892_v38, %v881_v39  ;;  %v894_v42 = vadd.f32 %v892_v38, %v890_v40 }
 0x23e   : > { %v895_v43 = vsub.f32 0.0, %v893_v41  ;;  %v896_v44 = vsub.f32 0.0, %v894_v42 }
 0x240   : > { %v897_v45 = vmul.f32 1.442695, %v895_v43  ;;  %v899_v46 = vmul.f32 1.442695, %v896_v44 }
 0x242   : > { %1239 = vpow2.f32 %v897_v45 }
 0x243   : > { %1241 = vpow2.f32 %v899_v46 }
 0x24c   : > { %v1240_v47 = vpop.eup %1239 }
 0x24d   : > { %v1242_v48 = vpop.eup %1241  ;;  %v901_v49 = vadd.f32 1.0, %v1240_v47 }
 0x24e   : > { %v902_v50 = vadd.f32 1.0, %v1242_v48 }
 0x24f   : > { %1243 = vrcp.f32 %v901_v49 }
 0x250   : > { %1245 = vrcp.f32 %v902_v50 }
 0x259   : > { %v1244_v59 = vpop.eup %1243 }
 0x25a   : > { %v1246_v60 = vpop.eup %1245  ;;  %v915_v61 = vmul.f32 %v1244_v59, %v907_v51  ;;  %v917_v62 = vmul.f32 %v1244_v59, %v909_v52  ;;  %v919_v63 = vmul.f32 %v1244_v59, %v911_v53  ;;  %v921_v3 = vmul.f32 %v1244_v59, %v913_v54 }
 0x25b   : > { %v916_v7 = vmul.f32 %v1246_v60, %v908_v55  ;;  %v918_v10 = vmul.f32 %v1246_v60, %v910_v56  ;;  %v920_v11 = vmul.f32 %v1246_v60, %v912_v57  ;;  %v922_v16 = vmul.f32 %v1246_v60, %v914_v58 }
 0x25c   : > { %v923_v17 = vadd.f32 %v915_v61, %v1492_v0  ;;  %v925_v22 = vadd.f32 %v917_v62, %v1502_v5  ;;  %v927_v23 = vadd.f32 %v919_v63, %v1516_v12  ;;  %v929_v24 = vadd.f32 %v921_v3, %v1528_v18 }
 0x25d   : > { %v924_v25 = vadd.f32 %v916_v7, %v1494_v1  ;;  %v926_v26 = vadd.f32 %v918_v10, %v1504_v6  ;;  %v928_v27 = vadd.f32 %v920_v11, %v1518_v13  ;;  %v930_v28 = vadd.f32 %v922_v16, %v1530_v19 }
 0x25e   : > { %v931_v29 = vadd.f32 %v923_v17, %v1496_v2  ;;  %v933_v30 = vadd.f32 %v925_v22, %v1508_v8  ;;  %v935_v31 = vadd.f32 %v927_v23, %v1520_v14  ;;  %v937_v32 = vadd.f32 %v929_v24, %v1532_v20 }
 0x25f   : > { %v932_v33 = vadd.f32 %v924_v25, %v1500_v4  ;;  %v934_v34 = vadd.f32 %v926_v26, %v1510_v9  ;;  %v936_v35 = vadd.f32 %v928_v27, %v1522_v15  ;;  %v938_v36 = vadd.f32 %v930_v28, %v1534_v21 }
 0x260   : > { %v939_v2 = vmul.f32 0.5, %v931_v29  ;;  %v941_v8 = vmul.f32 0.5, %v933_v30  ;;  %v943_v14 = vmul.f32 0.5, %v935_v31  ;;  %v945_v20 = vmul.f32 0.5, %v937_v32 }
 0x261   : > { %v940_v4 = vmul.f32 0.5, %v932_v33  ;;  %v942_v9 = vmul.f32 0.5, %v934_v34  ;;  %v944_v15 = vmul.f32 0.5, %v936_v35  ;;  %v946_v37 = vmul.f32 0.5, %v938_v36 }
 0x262   : > { %v947_v21 = vmax.f32 %v939_v2, 0.0  ;;  %v949_v38 = vmax.f32 %v941_v8, 0.0  ;;  %v951_v39 = vmax.f32 %v943_v14, 0.0  ;;  %v953_v40 = vmax.f32 %v945_v20, 0.0 }
 0x263   : > { %v948_v41 = vmax.f32 %v940_v4, 0.0  ;;  %v950_v42 = vmax.f32 %v942_v9, 0.0  ;;  %v952_v43 = vmax.f32 %v944_v15, 0.0  ;;  %v954_v44 = vmax.f32 %v946_v37, 0.0 }
 0x264   : > { %955 = vst [vmem:[%s1737_s0] sm:$0xff] %v947_v21  ;;  %957 = vst [vmem:[%s1737_s0 + $0x10] sm:$0xff] %v949_v38  ;;  %v963_v45 = vadd.f32 %v923_v17, %v1492_v0  ;;  %v964_v46 = vadd.f32 %v924_v25, %v1494_v1  ;;  %v965_v47 = vadd.f32 %v925_v22, %v1502_v5 }
 0x265   : > { %959 = vst [vmem:[%s1737_s0 + $0x20] sm:$0xff] %v951_v39  ;;  %961 = vst [vmem:[%s1737_s0 + $0x30] sm:$0xff] %v953_v40  ;;  %v966_v48 = vadd.f32 %v926_v26, %v1504_v6  ;;  %v967_v49 = vadd.f32 %v927_v23, %v1516_v12  ;;  %v968_v50 = vadd.f32 %v928_v27, %v1518_v13 }
 0x266   : > { %956 = vst [vmem:[%s1737_s0 + $0x8] sm:$0xff] %v948_v41  ;;  %958 = vst [vmem:[%s1737_s0 + $0x18] sm:$0xff] %v950_v42  ;;  %v969_v51 = vadd.f32 %v929_v24, %v1528_v18  ;;  %v970_v0 = vadd.f32 %v930_v28, %v1530_v19 }
 0x267   : > { %960 = vst [vmem:[%s1737_s0 + $0x28] sm:$0xff] %v952_v43  ;;  %962 = vst [vmem:[%s1737_s0 + $0x38] sm:$0xff] %v954_v44  ;;  %s1344_s0 = smov [#allocation3]  }
 0x268   : > { %s1251_s25 = sshll.u32 %s1344_s0, 4  ;;  %s1252_s25 = int_to_ptr.vmem [resolvable:$false] %s1251_s25 }
 0x269   : > { %s1253_s30 = scalar_lea.vmem %s1252_s25, 2048  ;;  %p1254_p0 = scmp.lt.s32.totalorder %s1747_s19, %s1252_s25 }
 0x26a   : > { %p1255_p1 = scmp.lt.s32.totalorder %s1253_s30, %s1247_s20 }
 0x26c   : > { %p1256_p2 = por %p1255_p1, %p1254_p0 }
 0x26e   : > { %p1257_p3 = pnand %p1256_p2, %p1250_p13 }
 0x270   : > { %1260 = shalt.err (!%p1257_p3)
}
 0x271   : > { %s1261_s29 = scalar_lea.hbm %s1745_s21, 1024  ;;  %s1265_s0 = scalar_lea.hbm %s1875_s15, 2048 }
 0x272   : > { %p1262_p4 = scmp.ne.s32.totalorder %s1745_s21, %s1261_s29  ;;  %p1266_p9 = scmp.lt.u32.totalorder %s1745_s21, %s1875_s15 }
 0x273   : > { %p1267_p10 = scmp.lt.u32.totalorder %s1265_s0, %s1261_s29  ;;  %p1269_p12 = scmp.lt.u32.totalorder %s1261_s29, %s1745_s21 }
 0x274   : > { %p1263_p7 = pnand %p1262_p4, %p1474_p5 }
 0x275   : > { %p1268_p11 = por %p1267_p10, %p1266_p9 }
 0x276   : > { %p1264_p8 = pneg %p1263_p7 }
 0x277   : > { %p1270_p13 = por %p1269_p12, %p1268_p11 }
 0x279   : > { %p1271_p0 = pnand %p1270_p13, %p1264_p8 }
 0x27b   : > { %1274 = shalt.err (!%p1271_p0)
}
 0x27c   : > { %s1345_s30 = smov 256   ;;  %s1346_s20 = smov 16   ;;  %v971_v1 = vmul.f32 0.5, %v963_v45  ;;  %v972_v5 = vmul.f32 0.5, %v964_v46  ;;  %v973_v6 = vmul.f32 0.5, %v965_v47  ;;  %v974_v12 = vmul.f32 0.5, %v966_v48 }
 0x27d   : > { %s1892_s28 = scalar_lea.sflag [#allocation4], %s1707_s27  ;;  %v975_v13 = vmul.f32 0.5, %v967_v49  ;;  %v976_v18 = vmul.f32 0.5, %v968_v50  ;;  %v977_v19 = vmul.f32 0.5, %v969_v51  ;;  %v978_v52 = vmul.f32 0.5, %v970_v0  ;;  %s1893_s2 = sshll.u32 %s1457_s14, 10 }
 0x27e   : > { %1158 = dma.vmem_to_hbm [thread:$0]  (%p1474_p5), %s1747_s19, 1024, %s1745_s21, %s1892_s28, %s1345_s30, %s1345_s30, %s1346_s20   ;;  %v979_v53 = vmax.f32 %v971_v1, 0.0  ;;  %v980_v54 = vmax.f32 %v972_v5, 0.0  ;;  %v981_v55 = vmax.f32 %v973_v6, 0.0  ;;  %v982_v56 = vmax.f32 %v974_v12, 0.0 }
 0x27f   : > { %v983_v57 = vmax.f32 %v975_v13, 0.0  ;;  %v984_v58 = vmax.f32 %v976_v18, 0.0  ;;  %v985_v59 = vmax.f32 %v977_v19, 0.0  ;;  %v986_v60 = vmax.f32 %v978_v52, 0.0  ;;  %s1802_s22 = scalar_lea.hbm %s1876_s16, %s1893_s2  ;;  %s1894_s29 = sshll.u32 %s1767_s1, 4  ;;  %s1806_s29 = int_to_ptr.vmem [resolvable:$true] %s1894_s29 }
 0x280   : > { %987 = vst [vmem:[%s1767_s1] sm:$0xff] %v979_v53  ;;  %988 = vst [vmem:[%s1767_s1 + $0x8] sm:$0xff] %v980_v54  ;;  %s1275_s0 = scalar_lea.vmem %s1806_s29, 1024  ;;  %s1347_s25 = smov [#allocation5]  }
 0x281   : > { %989 = vst [vmem:[%s1767_s1 + $0x10] sm:$0xff] %v981_v55  ;;  %990 = vst [vmem:[%s1767_s1 + $0x18] sm:$0xff] %v982_v56  ;;  %p1276_p1 = scmp.ne.s32.totalorder %s1806_s29, %s1275_s0  ;;  %s1279_s28 = sshll.u32 %s1347_s25, 4  ;;  %s1280_s28 = int_to_ptr.vmem [resolvable:$false] %s1279_s28 }
 0x282   : > { %991 = vst [vmem:[%s1767_s1 + $0x20] sm:$0xff] %v983_v57  ;;  %992 = vst [vmem:[%s1767_s1 + $0x28] sm:$0xff] %v984_v58  ;;  %s1281_s2 = scalar_lea.vmem %s1280_s28, 2048  ;;  %p1282_p4 = scmp.lt.s32.totalorder %s1806_s29, %s1280_s28 }
 0x283   : > { %993 = vst [vmem:[%s1767_s1 + $0x30] sm:$0xff] %v985_v59  ;;  %994 = vst [vmem:[%s1767_s1 + $0x38] sm:$0xff] %v986_v60  ;;  %p1277_p2 = pnand %p1276_p1, %p1474_p5  ;;  %p1283_p7 = scmp.lt.s32.totalorder %s1281_s2, %s1275_s0 }
 0x285   : > { %p1278_p3 = pneg %p1277_p2  ;;  %p1284_p8 = por %p1283_p7, %p1282_p4 }
 0x287   : > { %p1285_p9 = pnand %p1284_p8, %p1278_p3 }
 0x289   : > { %1288 = shalt.err (!%p1285_p9)
}
 0x28a   : > { %s1289_s1 = scalar_lea.hbm %s1802_s22, 1024  ;;  %s1293_s25 = scalar_lea.hbm %s1876_s16, 2048 }
 0x28b   : > { %p1290_p10 = scmp.ne.s32.totalorder %s1802_s22, %s1289_s1  ;;  %p1294_p13 = scmp.lt.u32.totalorder %s1802_s22, %s1876_s16 }
 0x28c   : > { %p1295_p0 = scmp.lt.u32.totalorder %s1293_s25, %s1289_s1  ;;  %p1297_p2 = scmp.lt.u32.totalorder %s1289_s1, %s1802_s22 }
 0x28d   : > { %p1291_p11 = pnand %p1290_p10, %p1474_p5 }
 0x28e   : > { %p1296_p1 = por %p1295_p0, %p1294_p13 }
 0x28f   : > { %p1292_p12 = pneg %p1291_p11 }
 0x290   : > { %p1298_p3 = por %p1297_p2, %p1296_p1 }
 0x292   : > { %p1299_p4 = pnand %p1298_p3, %p1292_p12 }
 0x294   : > { %1302 = shalt.err (!%p1299_p4)
}
 0x295   : > { %s1895_s0 = scalar_lea.sflag [#allocation6], %s1707_s27 }
 0x296   : > { %1159 = dma.vmem_to_hbm [thread:$0]  (%p1474_p5), %s1806_s29, 1024, %s1802_s22, %s1895_s0, %s1345_s30, %s1345_s30, %s1346_s20  }
 0x297 PF: > { %p1169_p7 = scmp.ge.s32.totalorder %s1341_s26, 2  ;;  %s1045_s14 = sand.u32 1, %s1329_s23  }
 0x298   : > { %s1046_s2 = scalar_lea.sflag [#allocation4], %s1045_s14 }
 0x299   : > { %p1163_p8 = pnand %p1169_p7, %p1478_p6 }
 0x29b   : > { %1320 = dma.done.wait (!%p1163_p8), %s1046_s2, 1024  }
 0x29c   : > { %1322 = vsyncadd (!%p1163_p8), %s1046_s2, 4294966272  ;;  %s1055_s17 = scalar_lea.sflag [#allocation6], %s1045_s14 }
 0x29d   : > { %1324 = dma.done.wait (!%p1163_p8), %s1055_s17, 1024  }
 0x29e   : > { %1326 = vsyncadd (!%p1163_p8), %s1055_s17, 4294966272  ;;  %s1896_s26 = sld [smem:[#allocation10_spill]]  ;;  %s1897_s27 = sld [smem:[#allocation9_spill]] }
 0x29f   : > { %s1898_s25 = sld [smem:[#allocation11_spill]]  ;;  %s1899_s23 = smov %s1333_s24 }
 0x2a4   : > { %p31_p5 = scmp.ge.s32.totalorder %s1896_s26, 4   ;;  %s1900_s24 = smov %s1897_s27 }
 0x2a6   :  { %33 = sbr.rel (!%p31_p5) target bundleno = 10 (0xa), region = 135 }
 0x2ad   :  { %1060 = vsyncpa [#allocation4], 1 }
 0x2ae   :  { %1062 = vsyncpa [#allocation4 + $0x1], 1 }
 0x2af   :  { %1063 = vsyncpa [#allocation6], 1 }
 0x2b0   :  { %1065 = vsyncpa [#allocation6 + $0x1], 1 }

</bundles_post_ra>
